<compile_context>
chip_gen: v5e
topology: v5e:2x2
jax: 0.10.0
libtpu: 0.0.40
codegen_flags: <defaults>
</compile_context>

<pallas_src>
import math
import functools

import jax
import jax.numpy as jnp
from jax import lax
from jax.experimental import pallas as pl
from jax.experimental.pallas import tpu as pltpu

# --- config (mirrors the nn.Module's __init__ shape requirements) ---
BATCH = 2
SEQ = 8
HIDDEN = 32
NUM_HEADS = 4
HEAD_DIM = HIDDEN // NUM_HEADS


def _bert_self_attn_kernel(x_ref, w_ref, b_ref, out_ref, *,
                           batch, seq, hidden, num_heads, head_dim):
    x = x_ref[...]                        # (B*S, H)
    w = w_ref[...]                        # (H, 3H)   pre-transposed & fused
    b = b_ref[...]                        # (1, 3H)

    # One fused Q/K/V projection on the MXU (f32 accumulation).
    qkv = jnp.dot(x, w, preferred_element_type=jnp.float32) + b   # (B*S, 3H)

    inv_sqrt_d = 1.0 / math.sqrt(head_dim)
    q = qkv[:, :hidden] * inv_sqrt_d      # scale folded into Q once
    k = qkv[:, hidden:2 * hidden]
    v = qkv[:, 2 * hidden:]

    # TODO(synk): clamp_inf only applies to fp16 tensors; this kernel runs in
    # f32 so it is a no-op. Dropout is eval-mode identity; no attention_mask /
    # head_mask; absolute position embeddings (relative branch not taken).

    # Per-(batch, head) attention; heads are contiguous hidden-dim slices
    # (matches transpose_for_scores). Results are gathered locally and
    # written with ONE lane-dense full-block store at the end.
    ctx_rows = []
    for bi in range(batch):
        lo_r = bi * seq
        qb = q[lo_r:lo_r + seq, :]        # (S, H)
        kb = k[lo_r:lo_r + seq, :]
        vb = v[lo_r:lo_r + seq, :]
        head_ctx = []
        for h in range(num_heads):
            lo = h * head_dim
            hi = lo + head_dim
            qh = qb[:, lo:hi]             # (S, d)
            kh = kb[:, lo:hi]
            vh = vb[:, lo:hi]

            # Contract last dims directly -> no explicit kh.T (no XLU xpose).
            s = lax.dot_general(qh, kh, (((1,), (1,)), ((), ())),
                                preferred_element_type=jnp.float32)   # (S, S)

            # Numerically stable softmax over the key axis.
            m = jnp.max(s, axis=-1, keepdims=True)
            p = jnp.exp(s - m)
            p = p * pl.reciprocal(jnp.sum(p, axis=-1, keepdims=True),
                                  approx=True)

            head_ctx.append(jnp.dot(p, vh,
                                    preferred_element_type=jnp.float32))
        ctx_rows.append(jnp.concatenate(head_ctx, axis=1))    # (S, H)
    ctx = jnp.concatenate(ctx_rows, axis=0)                   # (B*S, H)

    # Single full-block store: [ctx | K | V] as one (B*S, 3H) slab.
    out = jnp.concatenate([ctx, qkv[:, hidden:]], axis=1)     # (B*S, 3H)
    out_ref[...] = out.astype(out_ref.dtype)


def bert_self_attention(hidden_states, wq, bq, wk, bk, wv, bv,
                        num_heads=NUM_HEADS):
    """hidden_states: [B, S, H]; w*: [H_out, H_in] (PyTorch Linear layout);
    b*: [H_out]. Returns (context [B,S,H], past_key_value = (K, V) each
    [B, num_heads, S, head_dim])."""
    B, S, H = hidden_states.shape
    head_dim = H // num_heads
    BS = B * S

    # Glue: pre-transpose the Linear weights and fuse Q/K/V into one (H, 3H)
    # matrix (+ one (1, 3H) bias); flatten the batch for a single grid step.
    w_qkv = jnp.concatenate([wq.T, wk.T, wv.T], axis=1)        # (H, 3H)
    b_qkv = jnp.concatenate([bq, bk, bv]).reshape(1, 3 * H)    # (1, 3H)
    x2 = hidden_states.reshape(BS, H)

    kernel = functools.partial(
        _bert_self_attn_kernel, batch=B, seq=S, hidden=H,
        num_heads=num_heads, head_dim=head_dim)

    out = pl.pallas_call(
        kernel,
        out_shape=jax.ShapeDtypeStruct((BS, 3 * H), hidden_states.dtype),
        grid_spec=pltpu.PrefetchScalarGridSpec(
            num_scalar_prefetch=0,
            grid=(1,),   # whole (tiny) problem in one step; weights staged once
            in_specs=[
                pl.BlockSpec((BS, H), lambda i: (0, 0)),
                pl.BlockSpec((H, 3 * H), lambda i: (0, 0)),
                pl.BlockSpec((1, 3 * H), lambda i: (0, 0)),
            ],
            out_specs=pl.BlockSpec((BS, 3 * H), lambda i: (0, 0)),
        ),
        compiler_params=pltpu.CompilerParams(
            dimension_semantics=("arbitrary",)),
    )(x2, w_qkv, b_qkv)

    ctx = out[:, :H].reshape(B, S, H)
    k_proj = out[:, H:2 * H].reshape(B, S, H)
    v_proj = out[:, 2 * H:].reshape(B, S, H)

    # transpose_for_scores for past_key_value: [B, S, H] -> [B, nh, S, hd]
    key_layer = k_proj.reshape(B, S, num_heads, head_dim).transpose(0, 2, 1, 3)
    value_layer = v_proj.reshape(B, S, num_heads, head_dim).transpose(0, 2, 1, 3)
    return ctx, (key_layer, value_layer)


def _reference(hidden_states, wq, bq, wk, bk, wv, bv, num_heads=NUM_HEADS):
    B, S, H = hidden_states.shape
    d = H // num_heads
    q = hidden_states @ wq.T + bq
    k = hidden_states @ wk.T + bk
    v = hidden_states @ wv.T + bv
    qh = q.reshape(B, S, num_heads, d).transpose(0, 2, 1, 3)
    kh = k.reshape(B, S, num_heads, d).transpose(0, 2, 1, 3)
    vh = v.reshape(B, S, num_heads, d).transpose(0, 2, 1, 3)
    scores = jnp.einsum('bhqd,bhkd->bhqk', qh, kh) / math.sqrt(d)
    probs = jax.nn.softmax(scores, axis=-1)
    ctx = jnp.einsum('bhqk,bhkd->bhqd', probs, vh)
    ctx = ctx.transpose(0, 2, 1, 3).reshape(B, S, H)
    return ctx, (kh, vh)


if __name__ == "__main__":
    key = jax.random.PRNGKey(0)
    k0, k1, k2, k3, k4, k5, k6 = jax.random.split(key, 7)

    hidden_states = jax.random.normal(k0, (BATCH, SEQ, HIDDEN), jnp.float32)

    # Deterministic parameter init (nn.Linear-style uniform bound).
    bound = 1.0 / math.sqrt(HIDDEN)
    wq = jax.random.uniform(k1, (HIDDEN, HIDDEN), jnp.float32, -bound, bound)
    wk = jax.random.uniform(k2, (HIDDEN, HIDDEN), jnp.float32, -bound, bound)
    wv = jax.random.uniform(k3, (HIDDEN, HIDDEN), jnp.float32, -bound, bound)
    bq = jax.random.uniform(k4, (HIDDEN,), jnp.float32, -bound, bound)
    bk = jax.random.uniform(k5, (HIDDEN,), jnp.float32, -bound, bound)
    bv = jax.random.uniform(k6, (HIDDEN,), jnp.float32, -bound, bound)

    ctx, (key_layer, value_layer) = bert_self_attention(
        hidden_states, wq, bq, wk, bk, wv, bv)
    jax.block_until_ready((ctx, key_layer, value_layer))

    ctx_ref, (k_ref, v_ref) = _reference(hidden_states, wq, bq, wk, bk, wv, bv)
    # ctx tolerance relaxed: approx (EUP) reciprocal in softmax ~1e-3 rel err.
    assert jnp.allclose(ctx, ctx_ref, atol=3e-3, rtol=3e-3)
    assert jnp.allclose(key_layer, k_ref, atol=1e-5, rtol=1e-5)
    assert jnp.allclose(value_layer, v_ref, atol=1e-5, rtol=1e-5)

    print("KERNEL_OK")
</pallas_src>

<mosaic_0001>
module attributes {stable_mosaic.version = 11 : i64} {
  func.func @_bert_self_attn_kernel(%arg0: i32, %arg1: memref<16x32xf32, #tpu.memory_space<vmem>>, %arg2: memref<32x96xf32, #tpu.memory_space<vmem>>, %arg3: memref<1x96xf32, #tpu.memory_space<vmem>>, %arg4: memref<16x96xf32, #tpu.memory_space<vmem>>) attributes {dimension_semantics = [#tpu.dimension_semantics<arbitrary>], iteration_bounds = array<i64: 1>, scalar_prefetch = 0 : i64, scratch_operands = 0 : i64, tpu.core_type = #tpu.core_type<tc>, window_params = [{pipeline_mode = #tpu.pipeline_mode<synchronous>, transform_indices = @transform_0, window_bounds = array<i64: 16, 32>}, {pipeline_mode = #tpu.pipeline_mode<synchronous>, transform_indices = @transform_1, window_bounds = array<i64: 32, 96>}, {pipeline_mode = #tpu.pipeline_mode<synchronous>, transform_indices = @transform_2, window_bounds = array<i64: 1, 96>}, {pipeline_mode = #tpu.pipeline_mode<synchronous>, transform_indices = @transform_3, window_bounds = array<i64: 16, 96>}]} {
    %c0 = arith.constant 0 : index
    %c0_0 = arith.constant 0 : index
    %0 = vector.load %arg1[%c0, %c0_0] : memref<16x32xf32, #tpu.memory_space<vmem>>, vector<16x32xf32>
    %c0_1 = arith.constant 0 : index
    %c0_2 = arith.constant 0 : index
    %1 = vector.load %arg2[%c0_1, %c0_2] : memref<32x96xf32, #tpu.memory_space<vmem>>, vector<32x96xf32>
    %c0_3 = arith.constant 0 : index
    %c0_4 = arith.constant 0 : index
    %2 = vector.load %arg3[%c0_3, %c0_4] : memref<1x96xf32, #tpu.memory_space<vmem>>, vector<1x96xf32>
    %cst = arith.constant dense<0.000000e+00> : vector<16x96xf32>
    %3 = tpu.matmul %0, %1, %cst {dimension_numbers = #tpu.dot_dimension_numbers<[1], [0], [0], [1], [0, 0, 1, 1], [], []>} : vector<16x32xf32>, vector<32x96xf32>, vector<16x96xf32> -> vector<16x96xf32>
    %4 = vector.broadcast %2 : vector<1x96xf32> to vector<16x96xf32>
    %5 = arith.addf %3, %4 : vector<16x96xf32>
    %6 = vector.extract_strided_slice %5 {offsets = [0, 0], sizes = [16, 32], strides = [1, 1]} : vector<16x96xf32> to vector<16x32xf32>
    %cst_5 = arith.constant 0.353553385 : f32
    %7 = vector.broadcast %cst_5 : f32 to vector<16x32xf32>
    %8 = arith.mulf %6, %7 : vector<16x32xf32>
    %9 = vector.extract_strided_slice %5 {offsets = [0, 32], sizes = [16, 32], strides = [1, 1]} : vector<16x96xf32> to vector<16x32xf32>
    %10 = vector.extract_strided_slice %5 {offsets = [0, 64], sizes = [16, 32], strides = [1, 1]} : vector<16x96xf32> to vector<16x32xf32>
    %11 = vector.extract_strided_slice %8 {offsets = [0, 0], sizes = [8, 32], strides = [1, 1]} : vector<16x32xf32> to vector<8x32xf32>
    %12 = vector.extract_strided_slice %9 {offsets = [0, 0], sizes = [8, 32], strides = [1, 1]} : vector<16x32xf32> to vector<8x32xf32>
    %13 = vector.extract_strided_slice %10 {offsets = [0, 0], sizes = [8, 32], strides = [1, 1]} : vector<16x32xf32> to vector<8x32xf32>
    %14 = vector.extract_strided_slice %11 {offsets = [0, 0], sizes = [8, 8], strides = [1, 1]} : vector<8x32xf32> to vector<8x8xf32>
    %15 = vector.extract_strided_slice %12 {offsets = [0, 0], sizes = [8, 8], strides = [1, 1]} : vector<8x32xf32> to vector<8x8xf32>
    %16 = vector.extract_strided_slice %13 {offsets = [0, 0], sizes = [8, 8], strides = [1, 1]} : vector<8x32xf32> to vector<8x8xf32>
    %cst_6 = arith.constant dense<0.000000e+00> : vector<8x8xf32>
    %17 = tpu.matmul %14, %15, %cst_6 {dimension_numbers = #tpu.dot_dimension_numbers<[1], [1], [0], [0], [0, 0, 1, 0], [], []>} : vector<8x8xf32>, vector<8x8xf32>, vector<8x8xf32> -> vector<8x8xf32>
    %cst_7 = arith.constant dense<0xFF800000> : vector<8xf32>
    %18 = vector.multi_reduction <maximumf>, %17, %cst_7 [1] : vector<8x8xf32> to vector<8xf32>
    %19 = vector.shape_cast %18 : vector<8xf32> to vector<8x1xf32>
    %20 = vector.broadcast %19 : vector<8x1xf32> to vector<8x8xf32>
    %21 = arith.subf %17, %20 : vector<8x8xf32>
    %22 = math.exp %21 : vector<8x8xf32>
    %cst_8 = arith.constant dense<0.000000e+00> : vector<8xf32>
    %23 = vector.multi_reduction <add>, %22, %cst_8 [1] : vector<8x8xf32> to vector<8xf32>
    %24 = vector.shape_cast %23 : vector<8xf32> to vector<8x1xf32>
    %25 = tpu.reciprocal %24 {approx = true} : vector<8x1xf32> -> vector<8x1xf32>
    %26 = vector.broadcast %25 : vector<8x1xf32> to vector<8x8xf32>
    %27 = arith.mulf %22, %26 : vector<8x8xf32>
    %cst_9 = arith.constant dense<0.000000e+00> : vector<8x8xf32>
    %28 = tpu.matmul %27, %16, %cst_9 {dimension_numbers = #tpu.dot_dimension_numbers<[1], [0], [0], [1], [0, 0, 1, 1], [], []>} : vector<8x8xf32>, vector<8x8xf32>, vector<8x8xf32> -> vector<8x8xf32>
    %29 = vector.extract_strided_slice %11 {offsets = [0, 8], sizes = [8, 8], strides = [1, 1]} : vector<8x32xf32> to vector<8x8xf32>
    %30 = vector.extract_strided_slice %12 {offsets = [0, 8], sizes = [8, 8], strides = [1, 1]} : vector<8x32xf32> to vector<8x8xf32>
    %31 = vector.extract_strided_slice %13 {offsets = [0, 8], sizes = [8, 8], strides = [1, 1]} : vector<8x32xf32> to vector<8x8xf32>
    %cst_10 = arith.constant dense<0.000000e+00> : vector<8x8xf32>
    %32 = tpu.matmul %29, %30, %cst_10 {dimension_numbers = #tpu.dot_dimension_numbers<[1], [1], [0], [0], [0, 0, 1, 0], [], []>} : vector<8x8xf32>, vector<8x8xf32>, vector<8x8xf32> -> vector<8x8xf32>
    %cst_11 = arith.constant dense<0xFF800000> : vector<8xf32>
    %33 = vector.multi_reduction <maximumf>, %32, %cst_11 [1] : vector<8x8xf32> to vector<8xf32>
    %34 = vector.shape_cast %33 : vector<8xf32> to vector<8x1xf32>
    %35 = vector.broadcast %34 : vector<8x1xf32> to vector<8x8xf32>
    %36 = arith.subf %32, %35 : vector<8x8xf32>
    %37 = math.exp %36 : vector<8x8xf32>
    %cst_12 = arith.constant dense<0.000000e+00> : vector<8xf32>
    %38 = vector.multi_reduction <add>, %37, %cst_12 [1] : vector<8x8xf32> to vector<8xf32>
    %39 = vector.shape_cast %38 : vector<8xf32> to vector<8x1xf32>
    %40 = tpu.reciprocal %39 {approx = true} : vector<8x1xf32> -> vector<8x1xf32>
    %41 = vector.broadcast %40 : vector<8x1xf32> to vector<8x8xf32>
    %42 = arith.mulf %37, %41 : vector<8x8xf32>
    %cst_13 = arith.constant dense<0.000000e+00> : vector<8x8xf32>
    %43 = tpu.matmul %42, %31, %cst_13 {dimension_numbers = #tpu.dot_dimension_numbers<[1], [0], [0], [1], [0, 0, 1, 1], [], []>} : vector<8x8xf32>, vector<8x8xf32>, vector<8x8xf32> -> vector<8x8xf32>
    %44 = vector.extract_strided_slice %11 {offsets = [0, 16], sizes = [8, 8], strides = [1, 1]} : vector<8x32xf32> to vector<8x8xf32>
    %45 = vector.extract_strided_slice %12 {offsets = [0, 16], sizes = [8, 8], strides = [1, 1]} : vector<8x32xf32> to vector<8x8xf32>
    %46 = vector.extract_strided_slice %13 {offsets = [0, 16], sizes = [8, 8], strides = [1, 1]} : vector<8x32xf32> to vector<8x8xf32>
    %cst_14 = arith.constant dense<0.000000e+00> : vector<8x8xf32>
    %47 = tpu.matmul %44, %45, %cst_14 {dimension_numbers = #tpu.dot_dimension_numbers<[1], [1], [0], [0], [0, 0, 1, 0], [], []>} : vector<8x8xf32>, vector<8x8xf32>, vector<8x8xf32> -> vector<8x8xf32>
    %cst_15 = arith.constant dense<0xFF800000> : vector<8xf32>
    %48 = vector.multi_reduction <maximumf>, %47, %cst_15 [1] : vector<8x8xf32> to vector<8xf32>
    %49 = vector.shape_cast %48 : vector<8xf32> to vector<8x1xf32>
    %50 = vector.broadcast %49 : vector<8x1xf32> to vector<8x8xf32>
    %51 = arith.subf %47, %50 : vector<8x8xf32>
    %52 = math.exp %51 : vector<8x8xf32>
    %cst_16 = arith.constant dense<0.000000e+00> : vector<8xf32>
    %53 = vector.multi_reduction <add>, %52, %cst_16 [1] : vector<8x8xf32> to vector<8xf32>
    %54 = vector.shape_cast %53 : vector<8xf32> to vector<8x1xf32>
    %55 = tpu.reciprocal %54 {approx = true} : vector<8x1xf32> -> vector<8x1xf32>
    %56 = vector.broadcast %55 : vector<8x1xf32> to vector<8x8xf32>
    %57 = arith.mulf %52, %56 : vector<8x8xf32>
    %cst_17 = arith.constant dense<0.000000e+00> : vector<8x8xf32>
    %58 = tpu.matmul %57, %46, %cst_17 {dimension_numbers = #tpu.dot_dimension_numbers<[1], [0], [0], [1], [0, 0, 1, 1], [], []>} : vector<8x8xf32>, vector<8x8xf32>, vector<8x8xf32> -> vector<8x8xf32>
    %59 = vector.extract_strided_slice %11 {offsets = [0, 24], sizes = [8, 8], strides = [1, 1]} : vector<8x32xf32> to vector<8x8xf32>
    %60 = vector.extract_strided_slice %12 {offsets = [0, 24], sizes = [8, 8], strides = [1, 1]} : vector<8x32xf32> to vector<8x8xf32>
    %61 = vector.extract_strided_slice %13 {offsets = [0, 24], sizes = [8, 8], strides = [1, 1]} : vector<8x32xf32> to vector<8x8xf32>
    %cst_18 = arith.constant dense<0.000000e+00> : vector<8x8xf32>
    %62 = tpu.matmul %59, %60, %cst_18 {dimension_numbers = #tpu.dot_dimension_numbers<[1], [1], [0], [0], [0, 0, 1, 0], [], []>} : vector<8x8xf32>, vector<8x8xf32>, vector<8x8xf32> -> vector<8x8xf32>
    %cst_19 = arith.constant dense<0xFF800000> : vector<8xf32>
    %63 = vector.multi_reduction <maximumf>, %62, %cst_19 [1] : vector<8x8xf32> to vector<8xf32>
    %64 = vector.shape_cast %63 : vector<8xf32> to vector<8x1xf32>
    %65 = vector.broadcast %64 : vector<8x1xf32> to vector<8x8xf32>
    %66 = arith.subf %62, %65 : vector<8x8xf32>
    %67 = math.exp %66 : vector<8x8xf32>
    %cst_20 = arith.constant dense<0.000000e+00> : vector<8xf32>
    %68 = vector.multi_reduction <add>, %67, %cst_20 [1] : vector<8x8xf32> to vector<8xf32>
    %69 = vector.shape_cast %68 : vector<8xf32> to vector<8x1xf32>
    %70 = tpu.reciprocal %69 {approx = true} : vector<8x1xf32> -> vector<8x1xf32>
    %71 = vector.broadcast %70 : vector<8x1xf32> to vector<8x8xf32>
    %72 = arith.mulf %67, %71 : vector<8x8xf32>
    %cst_21 = arith.constant dense<0.000000e+00> : vector<8x8xf32>
    %73 = tpu.matmul %72, %61, %cst_21 {dimension_numbers = #tpu.dot_dimension_numbers<[1], [0], [0], [1], [0, 0, 1, 1], [], []>} : vector<8x8xf32>, vector<8x8xf32>, vector<8x8xf32> -> vector<8x8xf32>
    %74 = tpu.concatenate %28, %43, %58, %73 in 1 : vector<8x8xf32>, vector<8x8xf32>, vector<8x8xf32>, vector<8x8xf32> -> vector<8x32xf32>
    %75 = vector.extract_strided_slice %8 {offsets = [8, 0], sizes = [8, 32], strides = [1, 1]} : vector<16x32xf32> to vector<8x32xf32>
    %76 = vector.extract_strided_slice %9 {offsets = [8, 0], sizes = [8, 32], strides = [1, 1]} : vector<16x32xf32> to vector<8x32xf32>
    %77 = vector.extract_strided_slice %10 {offsets = [8, 0], sizes = [8, 32], strides = [1, 1]} : vector<16x32xf32> to vector<8x32xf32>
    %78 = vector.extract_strided_slice %75 {offsets = [0, 0], sizes = [8, 8], strides = [1, 1]} : vector<8x32xf32> to vector<8x8xf32>
    %79 = vector.extract_strided_slice %76 {offsets = [0, 0], sizes = [8, 8], strides = [1, 1]} : vector<8x32xf32> to vector<8x8xf32>
    %80 = vector.extract_strided_slice %77 {offsets = [0, 0], sizes = [8, 8], strides = [1, 1]} : vector<8x32xf32> to vector<8x8xf32>
    %cst_22 = arith.constant dense<0.000000e+00> : vector<8x8xf32>
    %81 = tpu.matmul %78, %79, %cst_22 {dimension_numbers = #tpu.dot_dimension_numbers<[1], [1], [0], [0], [0, 0, 1, 0], [], []>} : vector<8x8xf32>, vector<8x8xf32>, vector<8x8xf32> -> vector<8x8xf32>
    %cst_23 = arith.constant dense<0xFF800000> : vector<8xf32>
    %82 = vector.multi_reduction <maximumf>, %81, %cst_23 [1] : vector<8x8xf32> to vector<8xf32>
    %83 = vector.shape_cast %82 : vector<8xf32> to vector<8x1xf32>
    %84 = vector.broadcast %83 : vector<8x1xf32> to vector<8x8xf32>
    %85 = arith.subf %81, %84 : vector<8x8xf32>
    %86 = math.exp %85 : vector<8x8xf32>
    %cst_24 = arith.constant dense<0.000000e+00> : vector<8xf32>
    %87 = vector.multi_reduction <add>, %86, %cst_24 [1] : vector<8x8xf32> to vector<8xf32>
    %88 = vector.shape_cast %87 : vector<8xf32> to vector<8x1xf32>
    %89 = tpu.reciprocal %88 {approx = true} : vector<8x1xf32> -> vector<8x1xf32>
    %90 = vector.broadcast %89 : vector<8x1xf32> to vector<8x8xf32>
    %91 = arith.mulf %86, %90 : vector<8x8xf32>
    %cst_25 = arith.constant dense<0.000000e+00> : vector<8x8xf32>
    %92 = tpu.matmul %91, %80, %cst_25 {dimension_numbers = #tpu.dot_dimension_numbers<[1], [0], [0], [1], [0, 0, 1, 1], [], []>} : vector<8x8xf32>, vector<8x8xf32>, vector<8x8xf32> -> vector<8x8xf32>
    %93 = vector.extract_strided_slice %75 {offsets = [0, 8], sizes = [8, 8], strides = [1, 1]} : vector<8x32xf32> to vector<8x8xf32>
    %94 = vector.extract_strided_slice %76 {offsets = [0, 8], sizes = [8, 8], strides = [1, 1]} : vector<8x32xf32> to vector<8x8xf32>
    %95 = vector.extract_strided_slice %77 {offsets = [0, 8], sizes = [8, 8], strides = [1, 1]} : vector<8x32xf32> to vector<8x8xf32>
    %cst_26 = arith.constant dense<0.000000e+00> : vector<8x8xf32>
    %96 = tpu.matmul %93, %94, %cst_26 {dimension_numbers = #tpu.dot_dimension_numbers<[1], [1], [0], [0], [0, 0, 1, 0], [], []>} : vector<8x8xf32>, vector<8x8xf32>, vector<8x8xf32> -> vector<8x8xf32>
    %cst_27 = arith.constant dense<0xFF800000> : vector<8xf32>
    %97 = vector.multi_reduction <maximumf>, %96, %cst_27 [1] : vector<8x8xf32> to vector<8xf32>
    %98 = vector.shape_cast %97 : vector<8xf32> to vector<8x1xf32>
    %99 = vector.broadcast %98 : vector<8x1xf32> to vector<8x8xf32>
    %100 = arith.subf %96, %99 : vector<8x8xf32>
    %101 = math.exp %100 : vector<8x8xf32>
    %cst_28 = arith.constant dense<0.000000e+00> : vector<8xf32>
    %102 = vector.multi_reduction <add>, %101, %cst_28 [1] : vector<8x8xf32> to vector<8xf32>
    %103 = vector.shape_cast %102 : vector<8xf32> to vector<8x1xf32>
    %104 = tpu.reciprocal %103 {approx = true} : vector<8x1xf32> -> vector<8x1xf32>
    %105 = vector.broadcast %104 : vector<8x1xf32> to vector<8x8xf32>
    %106 = arith.mulf %101, %105 : vector<8x8xf32>
    %cst_29 = arith.constant dense<0.000000e+00> : vector<8x8xf32>
    %107 = tpu.matmul %106, %95, %cst_29 {dimension_numbers = #tpu.dot_dimension_numbers<[1], [0], [0], [1], [0, 0, 1, 1], [], []>} : vector<8x8xf32>, vector<8x8xf32>, vector<8x8xf32> -> vector<8x8xf32>
    %108 = vector.extract_strided_slice %75 {offsets = [0, 16], sizes = [8, 8], strides = [1, 1]} : vector<8x32xf32> to vector<8x8xf32>
    %109 = vector.extract_strided_slice %76 {offsets = [0, 16], sizes = [8, 8], strides = [1, 1]} : vector<8x32xf32> to vector<8x8xf32>
    %110 = vector.extract_strided_slice %77 {offsets = [0, 16], sizes = [8, 8], strides = [1, 1]} : vector<8x32xf32> to vector<8x8xf32>
    %cst_30 = arith.constant dense<0.000000e+00> : vector<8x8xf32>
    %111 = tpu.matmul %108, %109, %cst_30 {dimension_numbers = #tpu.dot_dimension_numbers<[1], [1], [0], [0], [0, 0, 1, 0], [], []>} : vector<8x8xf32>, vector<8x8xf32>, vector<8x8xf32> -> vector<8x8xf32>
    %cst_31 = arith.constant dense<0xFF800000> : vector<8xf32>
    %112 = vector.multi_reduction <maximumf>, %111, %cst_31 [1] : vector<8x8xf32> to vector<8xf32>
    %113 = vector.shape_cast %112 : vector<8xf32> to vector<8x1xf32>
    %114 = vector.broadcast %113 : vector<8x1xf32> to vector<8x8xf32>
    %115 = arith.subf %111, %114 : vector<8x8xf32>
    %116 = math.exp %115 : vector<8x8xf32>
    %cst_32 = arith.constant dense<0.000000e+00> : vector<8xf32>
    %117 = vector.multi_reduction <add>, %116, %cst_32 [1] : vector<8x8xf32> to vector<8xf32>
    %118 = vector.shape_cast %117 : vector<8xf32> to vector<8x1xf32>
    %119 = tpu.reciprocal %118 {approx = true} : vector<8x1xf32> -> vector<8x1xf32>
    %120 = vector.broadcast %119 : vector<8x1xf32> to vector<8x8xf32>
    %121 = arith.mulf %116, %120 : vector<8x8xf32>
    %cst_33 = arith.constant dense<0.000000e+00> : vector<8x8xf32>
    %122 = tpu.matmul %121, %110, %cst_33 {dimension_numbers = #tpu.dot_dimension_numbers<[1], [0], [0], [1], [0, 0, 1, 1], [], []>} : vector<8x8xf32>, vector<8x8xf32>, vector<8x8xf32> -> vector<8x8xf32>
    %123 = vector.extract_strided_slice %75 {offsets = [0, 24], sizes = [8, 8], strides = [1, 1]} : vector<8x32xf32> to vector<8x8xf32>
    %124 = vector.extract_strided_slice %76 {offsets = [0, 24], sizes = [8, 8], strides = [1, 1]} : vector<8x32xf32> to vector<8x8xf32>
    %125 = vector.extract_strided_slice %77 {offsets = [0, 24], sizes = [8, 8], strides = [1, 1]} : vector<8x32xf32> to vector<8x8xf32>
    %cst_34 = arith.constant dense<0.000000e+00> : vector<8x8xf32>
    %126 = tpu.matmul %123, %124, %cst_34 {dimension_numbers = #tpu.dot_dimension_numbers<[1], [1], [0], [0], [0, 0, 1, 0], [], []>} : vector<8x8xf32>, vector<8x8xf32>, vector<8x8xf32> -> vector<8x8xf32>
    %cst_35 = arith.constant dense<0xFF800000> : vector<8xf32>
    %127 = vector.multi_reduction <maximumf>, %126, %cst_35 [1] : vector<8x8xf32> to vector<8xf32>
    %128 = vector.shape_cast %127 : vector<8xf32> to vector<8x1xf32>
    %129 = vector.broadcast %128 : vector<8x1xf32> to vector<8x8xf32>
    %130 = arith.subf %126, %129 : vector<8x8xf32>
    %131 = math.exp %130 : vector<8x8xf32>
    %cst_36 = arith.constant dense<0.000000e+00> : vector<8xf32>
    %132 = vector.multi_reduction <add>, %131, %cst_36 [1] : vector<8x8xf32> to vector<8xf32>
    %133 = vector.shape_cast %132 : vector<8xf32> to vector<8x1xf32>
    %134 = tpu.reciprocal %133 {approx = true} : vector<8x1xf32> -> vector<8x1xf32>
    %135 = vector.broadcast %134 : vector<8x1xf32> to vector<8x8xf32>
    %136 = arith.mulf %131, %135 : vector<8x8xf32>
    %cst_37 = arith.constant dense<0.000000e+00> : vector<8x8xf32>
    %137 = tpu.matmul %136, %125, %cst_37 {dimension_numbers = #tpu.dot_dimension_numbers<[1], [0], [0], [1], [0, 0, 1, 1], [], []>} : vector<8x8xf32>, vector<8x8xf32>, vector<8x8xf32> -> vector<8x8xf32>
    %138 = tpu.concatenate %92, %107, %122, %137 in 1 : vector<8x8xf32>, vector<8x8xf32>, vector<8x8xf32>, vector<8x8xf32> -> vector<8x32xf32>
    %139 = tpu.concatenate %74, %138 in 0 : vector<8x32xf32>, vector<8x32xf32> -> vector<16x32xf32>
    %140 = vector.extract_strided_slice %5 {offsets = [0, 32], sizes = [16, 64], strides = [1, 1]} : vector<16x96xf32> to vector<16x64xf32>
    %141 = tpu.concatenate %139, %140 in 1 : vector<16x32xf32>, vector<16x64xf32> -> vector<16x96xf32>
    %c0_38 = arith.constant 0 : index
    %c0_39 = arith.constant 0 : index
    %142 = vector.load %arg4[%c0_38, %c0_39] : memref<16x96xf32, #tpu.memory_space<vmem>>, vector<16x96xf32>
    tpu.vector_store %arg4[%c0_38, %c0_39], %141 {strides = array<i32>} : memref<16x96xf32, #tpu.memory_space<vmem>>, vector<16x96xf32>,
    return
  }
  func.func @transform_0(%arg0: i32) -> (i32, i32) {
    %c0_i32 = arith.constant 0 : i32
    %c0_i32_0 = arith.constant 0 : i32
    %c0_i32_1 = arith.constant 0 : i32
    return %c0_i32, %c0_i32_0 : i32, i32
  }
  func.func @transform_1(%arg0: i32) -> (i32, i32) {
    %c0_i32 = arith.constant 0 : i32
    %c0_i32_0 = arith.constant 0 : i32
    %c0_i32_1 = arith.constant 0 : i32
    return %c0_i32, %c0_i32_0 : i32, i32
  }
  func.func @transform_2(%arg0: i32) -> (i32, i32) {
    %c0_i32 = arith.constant 0 : i32
    %c0_i32_0 = arith.constant 0 : i32
    %c0_i32_1 = arith.constant 0 : i32
    return %c0_i32, %c0_i32_0 : i32, i32
  }
  func.func @transform_3(%arg0: i32) -> (i32, i32) {
    %c0_i32 = arith.constant 0 : i32
    %c0_i32_0 = arith.constant 0 : i32
    %c0_i32_1 = arith.constant 0 : i32
    return %c0_i32, %c0_i32_0 : i32, i32
  }
}

</mosaic_0001>

<bundles_post_ra>
// kernel: tpu_custom_call.1
= control target key start
LH: loop header
LB: loop body
LE: loop exit
PB: predicated region body
PF: predicated region fallthrough
CT: control target
= control target key end

     0   :  { %8 = vsyncpa [#allocation3], 0  ;;  %s986_s0 = inlined_call_operand.hbm [shape: f32[16,32], index: 0, kind: input, shape index: {}]   ;;  %s987_s1 = inlined_call_operand.hbm [shape: f32[32,96], index: 1, kind: input, shape index: {}]   ;;  %s988_s2 = inlined_call_operand.vmem [shape: f32[1,96], index: 2, kind: input, shape index: {}]   ;;  %s989_s3 = inlined_call_operand.hbm [shape: f32[16,96], index: 3, kind: output, shape index: {}]  }
   0x1   :  { %9 = vsyncpa [#allocation6], 0 }
   0x2   :  { %10 = vsyncpa [#allocation4], 0  ;;  %s15_s14 = sshll.u32 %s986_s0, 4  ;;  %s822_s15 = smov [#allocation2]   ;;  %s16_s14 = int_to_ptr.hbm [resolvable:$true] %s15_s14 }
   0x3   :  { %s17_s16 = sshll.u32 %s822_s15, 4  ;;  %s28_s19 = sshll.u32 %s987_s1, 4  ;;  %s18_s16 = int_to_ptr.vmem [resolvable:$true] %s17_s16  ;;  %s29_s19 = int_to_ptr.hbm [resolvable:$true] %s28_s19 }
   0x4   :  { %s823_s20 = smov 128   ;;  %s824_s21 = smov 8  }
   0x5   :  { %23 = dma.hbm_to_vmem [thread:$0]  %s16_s14, 256, %s18_s16, [#allocation3], %s823_s20, %s823_s20, %s824_s21  }
   0x6   :  { %s825_s22 = smov [#allocation5]  }
   0x7   :  { %s30_s23 = sshll.u32 %s825_s22, 4  ;;  %s31_s23 = int_to_ptr.vmem [resolvable:$true] %s30_s23 }
   0x8   :  { %36 = dma.hbm_to_vmem [thread:$0]  %s29_s19, 512, %s31_s23, [#allocation6], %s823_s20, %s823_s20, %s824_s21  }
   0x9   :  { %816 = dma.done.wait [#allocation3], 256  }
   0xa   :  { %817 = vsyncadd [#allocation3], 4294967040 }
   0xb   :  { %818 = dma.done.wait [#allocation6], 512  }
   0xc   :  { %819 = vsyncadd [#allocation6], 4294966784  ;;  %v52_v0 = vld [vmem:[#allocation5 + $0x18] sm:$0xff]  ;;  %v51_v1 = vld [vmem:[#allocation5 + $0x10] sm:$0xff]  ;;  %vm57_vm0 = vcmask 261120   ;;  %s826_s24 = smov 96  }
   0xd   :  { %76 = vmatpush.msra.mxu0 %v52_v0  ;;  %v50_v2 = vld [vmem:[#allocation5 + $0x8] sm:$0xff]  ;;  %v49_v3 = vld [vmem:[#allocation5] sm:$0xff]  ;;  %v47_v4 = vld [vmem:[#allocation2] sm:$0xff]  ;;  %s827_s25 = smov 112   ;;  %s828_s26 = smov 120   ;;  %vm92_vm1 = vcmask 64512  }
   0xe   :  { %v711_v5 = vld [vmem:[%s988_s2] ss:$0 sm:$0xff]  ;;  %s829_s27 = smov 88   ;;  %s830_s2 = smov 80   ;;  %v48_v9 = vld [vmem:[#allocation2 + $0x8] sm:$0xff]  ;;  %vm363_vm2 = vcmask 130048  }
   0xf   :  { %77 = vmatpush.msra.mxu0 %v51_v1  ;;  %s831_s28 = smov 72   ;;  %s832_s29 = smov 56   ;;  %vm365_vm3 = vcmask 195584   ;;  %vm644_vm4 = vcmask 785408  }
  0x10   :  { %s833_s30 = smov 64   ;;  %s834_s4 = smov 48  }
  0x11   :  { %78 = vmatpush.msra.mxu0 %v50_v2  ;;  %s835_s5 = smov 104   ;;  %s836_s6 = smov 40  }
  0x12   :  { %s837_s7 = smov 16   ;;  %s838_s8 = smov 24  }
  0x13   :  { %79 = vmatpush.msra.mxu0 %v49_v3  ;;  %s839_s9 = smov [#allocation7]   ;;  %s653_s13 = sshll.u32 %s989_s3, 4  ;;  %s654_s13 = int_to_ptr.hbm [resolvable:$true] %s653_s13 }
  0x14   :  { %667 = vmatmul.msk.f32.vlgmr.msra.gmra.mxu0 %vm57_vm0, %v47_v4  ;;  %s651_s10 = sshll.u32 %s839_s9, 4  ;;  %s652_s10 = int_to_ptr.vmem [resolvable:$true] %s651_s10 }
  0x1c   :  { %668 = vmatmul.msk.f32.gmra.mxu0 %vm57_vm0, %v48_v9 }
  0x91   :  { %v81_v6 = vpop.f32.mrf.mxu0 }
  0x92   :  { %v876_v7 = vadd.f32 %v711_v5, %v81_v6 }
  0x94   :  { %90 = vrot.lane.b32.xlu0 %v876_v7, %s826_s24  ;;  %v87_v8 = vmul.f32 0.35355338, %v876_v7 }
  0x96   :  { %220 = vrot.lane.b32.xlu2 %v87_v8, %s827_s25  ;;  %155 = vrot.lane.b32.xlu1 %v87_v8, %s828_s26 }
  0x99   :  { %v84_v21 = vpop.f32.mrf.mxu0 }
  0x9a   :  { %v901_v22 = vadd.f32 %v711_v5, %v84_v21 }
  0x9c   :  { %157 = vrot.lane.b32.xlu0 %v876_v7, %s829_s27  ;;  %v88_v23 = vmul.f32 0.35355338, %v901_v22 }
  0x9e   :  { %222 = vrot.lane.b32.xlu1 %v876_v7, %s830_s2 }
  0xa6   :  { %287 = vrot.lane.b32.xlu1 %v876_v7, %s831_s28 }
  0xf0   :  { %v221_v14 = vpop.permute.xlu2 %220 }
 0x106   :  { %v91_v10 = vpop.permute.xlu0 %90 }
 0x107   :  { %669 = vmatpush.xpose.msk.msra.mxu1 %vm92_vm1, %v91_v10 }
 0x108   :  { %v156_v11 = vpop.permute.xlu1 %155 }
 0x10a   :  { %670 = vmatmul.msk.f32.vlgmr.msra.gmra.mxu1 %vm92_vm1, %v87_v8 }
 0x10e   :  { %v158_v12 = vpop.permute.xlu0 %157 }
 0x10f   :  { %672 = vmatpush.xpose.msk.msra.mxu3 %vm92_vm1, %v158_v12 }
 0x110   :  { %v223_v13 = vpop.permute.xlu1 %222 }
 0x111   :  { %675 = vmatpush.xpose.msk.msrb.mxu1 %vm92_vm1, %v223_v13 }
 0x112   :  { %673 = vmatmul.msk.f32.vlgmr.msra.gmra.mxu3 %vm92_vm1, %v156_v11 }
 0x114   :  { %676 = vmatmul.msk.f32.vlgmr.msrb.gmra.mxu1 %vm92_vm1, %v221_v14 }
 0x118   :  { %v288_v26 = vpop.permute.xlu1 %287 }
 0x187   :  { %v115_v15 = vpop.f32.mrf.mxu1 }
 0x188   :  { %v118_v16 = vsel %vm92_vm1, %v115_v15, -inf }
 0x189   :  { %119 = vmax.xlane.f32.xlu2 %v118_v16 }
 0x191   :  { %v245_v17 = vpop.f32.mrf.mxu1 }
 0x192   :  { %v248_v18 = vsel %vm92_vm1, %v245_v17, -inf }
 0x193   :  { %249 = vmax.xlane.f32.xlu1 %v248_v18 }
 0x195   :  { %v180_v19 = vpop.f32.mrf.mxu3 }
 0x196   :  { %v183_v20 = vsel %vm92_vm1, %v180_v19, -inf }
 0x197   :  { %184 = vmax.xlane.f32.xlu0 %v183_v20 }
 0x1a1   :  { %194 = vrot.lane.b32.xlu2 %v876_v7, %s832_s29 }
 0x1a9   :  { %368 = vrot.lane.b32.xlu2 %v901_v22, %s826_s24 }
 0x1ab   :  { %129 = vrot.lane.b32.xlu0 %v876_v7, %s833_s30 }
 0x1ac   :  { %434 = vrot.lane.b32.xlu1 %v901_v22, %s829_s27 }
 0x1b1   :  { %499 = vrot.lane.b32.xlu2 %v901_v22, %s830_s2 }
 0x1b3   :  { %259 = vrot.lane.b32.xlu0 %v876_v7, %s834_s4 }
 0x1bb   :  { %285 = vrot.lane.b32.xlu0 %v87_v8, %s835_s5 }
 0x1c3   :  { %432 = vrot.lane.b32.xlu0 %v88_v23, %s828_s26 }
 0x1cb   :  { %497 = vrot.lane.b32.xlu0 %v88_v23, %s827_s25 }
 0x1fc   :  { %v120_v24 = vpop.xlane.xlu2 %119 }
 0x1fd   :  { %v121_v25 = vsub.f32 %v115_v15, %v120_v24 }
 0x1ff   :  { %v122_v27 = vmul.f32 1.442695, %v121_v25 }
 0x201   :  { %712 = vpow2.f32 %v122_v27 }
 0x204   :  { %v195_v41 = vpop.permute.xlu2 %194 }
 0x206   :  { %v250_v28 = vpop.xlane.xlu1 %249 }
 0x207   :  { %v713_v29 = vpop.eup %712  ;;  %v251_v30 = vsub.f32 %v245_v17, %v250_v28 }
 0x208   :  { %v124_v31 = vsel %vm92_vm1, %v713_v29, 0.0 }
 0x209   :  { %v252_v32 = vmul.f32 1.442695, %v251_v30  ;;  %125 = vadd.xlane.f32.xlu2 %v124_v31 }
 0x20a   :  { %v185_v33 = vpop.xlane.xlu0 %184 }
 0x20b   :  { %714 = vpow2.f32 %v252_v32  ;;  %v186_v34 = vsub.f32 %v180_v19, %v185_v33 }
 0x20c   :  { %v369_v43 = vpop.permute.xlu2 %368 }
 0x20d   :  { %v187_v35 = vmul.f32 1.442695, %v186_v34 }
 0x20f   :  { %716 = vpow2.f32 %v187_v35 }
 0x211   :  { %v715_v36 = vpop.eup %714 }
 0x212   :  { %v254_v37 = vsel %vm92_vm1, %v715_v36, 0.0 }
 0x213   :  { %255 = vadd.xlane.f32.xlu1 %v254_v37 }
 0x214   :  { %v500_v44 = vpop.permute.xlu2 %499 }
 0x215   :  { %v717_v38 = vpop.eup %716 }
 0x216   :  { %v189_v39 = vsel %vm92_vm1, %v717_v38, 0.0 }
 0x217   :  { %190 = vadd.xlane.f32.xlu2 %v189_v39 }
 0x21d   :  { %v130_v40 = vpop.permute.xlu0 %129 }
 0x21e   :  { %150 = vmatpush.msra.mxu2 %v130_v40  ;;  %v435_v46 = vpop.permute.xlu1 %434 }
 0x220   :  { %215 = vmatpush.msrb.mxu2 %v195_v41 }
 0x225   :  { %v260_v42 = vpop.permute.xlu0 %259 }
 0x226   :  { %280 = vmatpush.msrb.mxu3 %v260_v42 }
 0x228   :  { %681 = vmatpush.xpose.msk.msra.mxu3 %vm92_vm1, %v369_v43 }
 0x22c   :  { %564 = vrot.lane.b32.xlu1 %v901_v22, %s831_s28 }
 0x22d   :  { %v286_v52 = vpop.permute.xlu0 %285 }
 0x22f   :  { %562 = vrot.lane.b32.xlu2 %v88_v23, %s835_s5 }
 0x235   :  { %v433_v56 = vpop.permute.xlu0 %432 }
 0x23d   :  { %v498_v58 = vpop.permute.xlu0 %497 }
 0x27c   :  { %v126_v45 = vpop.xlane.xlu2 %125 }
 0x27d   :  { %718 = vrcp.f32 %v126_v45 }
 0x283   :  { %v719_v47 = vpop.eup %718 }
 0x284   :  { %v128_v48 = vmul.f32 %v719_v47, %v713_v29 }
 0x286   :  { %v256_v49 = vpop.xlane.xlu1 %255  ;;  %671 = vmatmul.msk.f32.vlgmr.msra.gmra.mxu2 %vm92_vm1, %v128_v48 }
 0x287   :  { %720 = vrcp.f32 %v256_v49  ;;  %678 = vmatpush.xpose.msk.msra.mxu2 %vm92_vm1, %v288_v26 }
 0x28a   :  { %v191_v50 = vpop.xlane.xlu2 %190 }
 0x28b   :  { %722 = vrcp.f32 %v191_v50 }
 0x28d   :  { %v721_v51 = vpop.eup %720 }
 0x28e   :  { %v258_v53 = vmul.f32 %v721_v51, %v715_v36 }
 0x290   :  { %677 = vmatmul.msk.f32.vlgmr.msrb.gmra.mxu3 %vm92_vm1, %v258_v53 }
 0x291   :  { %v723_v54 = vpop.eup %722  ;;  %687 = vmatpush.xpose.msk.msrb.mxu3 %vm92_vm1, %v500_v44 }
 0x292   :  { %v193_v55 = vmul.f32 %v723_v54, %v717_v38  ;;  %v563_v59 = vpop.permute.xlu2 %562 }
 0x294   :  { %674 = vmatmul.msk.f32.vlgmr.msrb.gmra.mxu2 %vm92_vm1, %v193_v55 }
 0x295   :  { %684 = vmatpush.xpose.msk.msrb.mxu2 %vm92_vm1, %v435_v46 }
 0x298   :  { %682 = vmatmul.msk.f32.vlgmr.msra.gmra.mxu3 %vm92_vm1, %v88_v23 }
 0x29c   :  { %679 = vmatmul.msk.f32.vlgmr.msra.gmra.mxu2 %vm92_vm1, %v286_v52 }
 0x29e   :  { %v565_v57 = vpop.permute.xlu1 %564 }
 0x29f   :  { %690 = vmatpush.xpose.msk.msra.mxu2 %vm92_vm1, %v565_v57 }
 0x2a0   :  { %688 = vmatmul.msk.f32.vlgmr.msrb.gmra.mxu3 %vm92_vm1, %v498_v58 }
 0x2a4   :  { %685 = vmatmul.msk.f32.vlgmr.msrb.gmra.mxu2 %vm92_vm1, %v433_v56 }
 0x2ac   :  { %691 = vmatmul.msk.f32.vlgmr.msra.gmra.mxu2 %vm92_vm1, %v563_v59 }
 0x309   :  { %v936_v60 = vpop.f32.mrf.mxu2 }
 0x313   :  { %v282_v61 = vpop.f32.mrf.mxu3 }
 0x317   :  { %v217_v62 = vpop.f32.mrf.mxu2 }
 0x31b   :  { %v392_v63 = vpop.f32.mrf.mxu3 }
 0x31c   :  { %v395_v0 = vsel %vm92_vm1, %v392_v63, -inf }
 0x31d   :  { %396 = vmax.xlane.f32.xlu0 %v395_v0 }
 0x31f   :  { %v310_v1 = vpop.f32.mrf.mxu2 }
 0x320   :  { %v313_v2 = vsel %vm92_vm1, %v310_v1, -inf }
 0x321   :  { %314 = vmax.xlane.f32.xlu1 %v313_v2 }
 0x323   :  { %v522_v3 = vpop.f32.mrf.mxu3 }
 0x324   :  { %v525_v6 = vsel %vm92_vm1, %v522_v3, -inf }
 0x327   :  { %v457_v4 = vpop.f32.mrf.mxu2 }
 0x328   :  { %v460_v5 = vsel %vm92_vm1, %v457_v4, -inf }
 0x329   :  { %461 = vmax.xlane.f32.xlu2 %v460_v5  ;;  %526 = vmax.xlane.f32.xlu1 %v525_v6 }
 0x32f   :  { %v587_v8 = vpop.f32.mrf.mxu2 }
 0x330   :  { %v590_v9 = vsel %vm92_vm1, %v587_v8, -inf }
 0x331   :  { %591 = vmax.xlane.f32.xlu0 %v590_v9 }
 0x341   :  { %324 = vrot.lane.b32.xlu2 %v876_v7, %s836_s6 }
 0x345   :  { %406 = vrot.lane.b32.xlu0 %v901_v22, %s833_s30 }
 0x390   :  { %v397_v10 = vpop.xlane.xlu0 %396 }
 0x391   :  { %v398_v11 = vsub.f32 %v392_v63, %v397_v10 }
 0x393   :  { %v399_v12 = vmul.f32 1.442695, %v398_v11 }
 0x394   :  { %v315_v13 = vpop.xlane.xlu1 %314 }
 0x395   :  { %724 = vpow2.f32 %v399_v12  ;;  %v316_v14 = vsub.f32 %v310_v1, %v315_v13 }
 0x397   :  { %v317_v15 = vmul.f32 1.442695, %v316_v14 }
 0x399   :  { %726 = vpow2.f32 %v317_v15 }
 0x39b   :  { %v725_v16 = vpop.eup %724 }
 0x39c   :  { %v527_v17 = vpop.xlane.xlu1 %526  ;;  %v462_v18 = vpop.xlane.xlu2 %461  ;;  %v401_v19 = vsel %vm92_vm1, %v725_v16, 0.0 }
 0x39d   :  { %v528_v20 = vsub.f32 %v522_v3, %v527_v17  ;;  %v463_v21 = vsub.f32 %v457_v4, %v462_v18  ;;  %402 = vadd.xlane.f32.xlu1 %v401_v19 }
 0x39f   :  { %v727_v23 = vpop.eup %726  ;;  %v529_v24 = vmul.f32 1.442695, %v528_v20  ;;  %v464_v25 = vmul.f32 1.442695, %v463_v21 }
 0x3a0   :  { %v319_v26 = vsel %vm92_vm1, %v727_v23, 0.0 }
 0x3a1   :  { %728 = vpow2.f32 %v529_v24  ;;  %320 = vadd.xlane.f32.xlu2 %v319_v26 }
 0x3a2   :  { %730 = vpow2.f32 %v464_v25 }
 0x3a4   :  { %v592_v27 = vpop.xlane.xlu0 %591  ;;  %v325_v28 = vpop.permute.xlu2 %324 }
 0x3a5   :  { %v593_v29 = vsub.f32 %v587_v8, %v592_v27  ;;  %345 = vmatpush.msra.mxu1 %v325_v28 }
 0x3a7   :  { %v729_v30 = vpop.eup %728  ;;  %v594_v31 = vmul.f32 1.442695, %v593_v29 }
 0x3a8   :  { %v731_v32 = vpop.eup %730  ;;  %v531_v33 = vsel %vm92_vm1, %v729_v30, 0.0 }
 0x3a9   :  { %732 = vpow2.f32 %v594_v31  ;;  %532 = vadd.xlane.f32.xlu1 %v531_v33  ;;  %v466_v34 = vsel %vm92_vm1, %v731_v32, 0.0 }
 0x3aa   :  { %467 = vadd.xlane.f32.xlu0 %v466_v34 }
 0x3af   :  { %v733_v35 = vpop.eup %732 }
 0x3b0   :  { %v596_v36 = vsel %vm92_vm1, %v733_v35, 0.0 }
 0x3b1   :  { %597 = vadd.xlane.f32.xlu1 %v596_v36 }
 0x3b7   :  { %v407_v37 = vpop.permute.xlu0 %406 }
 0x3b8   :  { %427 = vmatpush.msrb.mxu0 %v407_v37 }
 0x3b9   :  { %536 = vrot.lane.b32.xlu2 %v901_v22, %s834_s4 }
 0x3be   :  { %601 = vrot.lane.b32.xlu0 %v901_v22, %s836_s6 }
 0x3c1   :  { %351 = vrot.lane.b32.xlu2 %v217_v62, %s824_s21 }
 0x3c6   :  { %355 = vrot.lane.b32.xlu0 %v282_v61, %s837_s7 }
 0x3ca   :  { %471 = vrot.lane.b32.xlu1 %v901_v22, %s832_s29 }
 0x410   :  { %v403_v38 = vpop.xlane.xlu1 %402 }
 0x411   :  { %734 = vrcp.f32 %v403_v38 }
 0x414   :  { %v321_v39 = vpop.xlane.xlu2 %320 }
 0x415   :  { %736 = vrcp.f32 %v321_v39 }
 0x417   :  { %v735_v40 = vpop.eup %734 }
 0x418   :  { %v405_v41 = vmul.f32 %v735_v40, %v725_v16 }
 0x41a   :  { %683 = vmatmul.msk.f32.vlgmr.msrb.gmra.mxu0 %vm92_vm1, %v405_v41 }
 0x41b   :  { %v737_v42 = vpop.eup %736 }
 0x41c   :  { %v323_v43 = vmul.f32 %v737_v42, %v727_v23  ;;  %v533_v44 = vpop.xlane.xlu1 %532  ;;  %v537_v45 = vpop.permute.xlu2 %536 }
 0x41d   :  { %738 = vrcp.f32 %v533_v44  ;;  %557 = vmatpush.msra.mxu0 %v537_v45  ;;  %v468_v48 = vpop.xlane.xlu0 %467 }
 0x41e   :  { %680 = vmatmul.msk.f32.vlgmr.msra.gmra.mxu1 %vm92_vm1, %v323_v43  ;;  %740 = vrcp.f32 %v468_v48 }
 0x423   :  { %v739_v46 = vpop.eup %738 }
 0x424   :  { %v535_v47 = vmul.f32 %v739_v46, %v729_v30  ;;  %v598_v49 = vpop.xlane.xlu1 %597  ;;  %v741_v50 = vpop.eup %740 }
 0x425   :  { %742 = vrcp.f32 %v598_v49  ;;  %v470_v51 = vmul.f32 %v741_v50, %v731_v32  ;;  %v352_v62 = vpop.permute.xlu2 %351 }
 0x426   :  { %689 = vmatmul.msk.f32.vlgmr.msra.gmra.mxu0 %vm92_vm1, %v535_v47  ;;  %v362_v0 = vsel %vm92_vm1, %v936_v60, %v352_v62 }
 0x42b   :  { %v743_v54 = vpop.eup %742 }
 0x42c   :  { %v600_v55 = vmul.f32 %v743_v54, %v733_v35 }
 0x430   :  { %v602_v53 = vpop.permute.xlu0 %601 }
 0x438   :  { %v356_v63 = vpop.permute.xlu0 %355 }
 0x439   :  { %v364_v1 = vsel %vm363_vm2, %v362_v0, %v356_v63 }
 0x43c   :  { %v472_v52 = vpop.permute.xlu1 %471 }
 0x43d   :  { %492 = vmatpush.msrb.mxu1 %v472_v52 }
 0x43e   :  { %686 = vmatmul.msk.f32.vlgmr.msrb.gmra.mxu1 %vm92_vm1, %v470_v51 }
 0x43f   :  { %622 = vmatpush.msra.mxu1 %v602_v53 }
 0x446   :  { %692 = vmatmul.msk.f32.vlgmr.msra.gmra.mxu1 %vm92_vm1, %v600_v55 }
 0x497   :  { %v429_v56 = vpop.f32.mrf.mxu0 }
 0x49b   :  { %v347_v57 = vpop.f32.mrf.mxu1 }
 0x49c   :  { %359 = vrot.lane.b32.xlu2 %v347_v57, %s838_s8 }
 0x4a3   :  { %v559_v58 = vpop.f32.mrf.mxu0 }
 0x4a4   :  { %632 = vrot.lane.b32.xlu1 %v559_v58, %s837_s7 }
 0x4bb   :  { %v494_v59 = vpop.f32.mrf.mxu1 }
 0x4bc   :  { %628 = vrot.lane.b32.xlu0 %v494_v59, %s824_s21 }
 0x4c3   :  { %v624_v61 = vpop.f32.mrf.mxu1 }
 0x4c4   :  { %636 = vrot.lane.b32.xlu2 %v624_v61, %s838_s8 }
 0x4f6   :  { %v360_v2 = vpop.permute.xlu2 %359 }
 0x4f7   :  { %v366_v3 = vsel %vm365_vm3, %v364_v1, %v360_v2 }
 0x4f8   :  { %v642_v4 = vsel %vm57_vm0, %v366_v3, %v876_v7 }
 0x4f9   :  { %645 = vst.msk [vmem:[#allocation7] sm:$0xff] %vm644_vm4, %v642_v4 }
 0x516   :  { %v633_v6 = vpop.permute.xlu1 %632 }
 0x51e   :  { %v637_v8 = vpop.permute.xlu2 %636 }
 0x52e   :  { %v629_v5 = vpop.permute.xlu0 %628 }
 0x52f   :  { %v639_v60 = vsel %vm92_vm1, %v429_v56, %v629_v5 }
 0x530   :  { %v640_v9 = vsel %vm363_vm2, %v639_v60, %v633_v6 }
 0x531   :  { %v641_v10 = vsel %vm365_vm3, %v640_v9, %v637_v8 }
 0x532   :  { %v643_v7 = vsel %vm57_vm0, %v641_v10, %v901_v22 }
 0x533   :  { %646 = vst.msk [vmem:[#allocation7 + $0x8] sm:$0xff] %vm644_vm4, %v643_v7 }
 0x534   :  { %659 = dma.vmem_to_hbm [thread:$0]  %s652_s10, 256, %s654_s13, [#allocation4], %s823_s20, %s823_s20, %s824_s21  }
 0x535   :  { %820 = dma.done.wait [#allocation4], 256  }
 0x536   :  { %821 = vsyncadd [#allocation4], 4294967040 }
 0x537   :  { %664 = vsyncpa [#allocation3], 1 }
 0x538   :  { %665 = vsyncpa [#allocation6], 1 }
 0x539   :  { %666 = vsyncpa [#allocation4], 1 }

</bundles_post_ra>
